<compile_context>
chip_gen: v7x
topology: tpu7x:2x2x1
jax: 0.10.0
libtpu: 0.0.40
codegen_flags: <defaults>
</compile_context>

<pallas_src>
import functools

import jax
import jax.numpy as jnp
from jax.experimental import pallas as pl
from jax.experimental.pallas import tpu as pltpu

EPS = 1e-5

_FUSED_VMEM_BUDGET = 6 * 1024 * 1024    # whole-problem-in-VMEM fast path
_PASS2_VMEM_BUDGET = 20 * 1024 * 1024   # resident-weight matmul working set
_VMEM_LIMIT_BYTES = 32 * 1024 * 1024    # safe scoped-VMEM request on v5e/v6e/v7x


def _round_up(x, m):
    return (x + m - 1) // m * m


def _cdiv(a, b):
    return -(-a // b)


def _pick_tile(extent, max_block, align, min_tiles=1):
    """Return (block, padded_extent) with block a multiple of `align` and
    <= round_up(max_block, align).  The tile COUNT is chosen first so padding
    stays around one alignment group instead of rounding up to a whole block
    (B=520 pads to 528, not 1024)."""
    ea = _round_up(max(extent, 1), align)
    max_blk = _round_up(min(max_block, ea), align)
    n0 = max(min_tiles, _cdiv(ea, max_blk))
    best = None
    for n in range(n0, n0 + 8):
        blk = _round_up(_cdiv(ea, n), align)
        pad = blk * n - ea
        if best is None or pad < best[2]:
            best = (blk, blk * n, pad)
        if pad == 0:
            break
    return best[0], best[1]


# -----------------------------------------------------------------------------
# Fused fast path: stats + BN-fold + matmul in a single kernel (everything VMEM
# resident).  Used when the padded problem fits well under the scoped-VMEM limit.
# -----------------------------------------------------------------------------
def fused_taskhead_kernel(x_ref, w_ref, b_ref, o_ref, *, n_batch, compute_dtype):
    x = x_ref[...].astype(jnp.float32)                              # (Bp, Dp)
    mean = jnp.sum(x, axis=0, keepdims=True) * (1.0 / n_batch)      # padded rows are 0
    var = jnp.maximum(jnp.sum(x * x, axis=0, keepdims=True) * (1.0 / n_batch)
                      - mean * mean, 0.0)                           # biased (training BN)
    inv = jax.lax.rsqrt(var + EPS)
    xn = ((x - mean) * inv).astype(compute_dtype)
    acc = jnp.dot(xn, w_ref[...].astype(compute_dtype),
                  preferred_element_type=jnp.float32)
    o_ref[...] = (acc + b_ref[...].astype(jnp.float32)).astype(o_ref.dtype)


# -----------------------------------------------------------------------------
# Pass 1: streaming batch statistics (sum / sum-of-squares per feature).
# Grid = (D tiles [parallel], B tiles [arbitrary / reduction]).
# Outputs are (8, D) per-sublane partial sums; the 8-way fold happens once outside,
# so the hot loop is pure VPU + DMA (no per-tile XLU reduction, no normalized copy).
# -----------------------------------------------------------------------------
def bn_stats_kernel(x_ref, sum_ref, sq_ref):
    @pl.when(pl.program_id(1) == 0)
    def _():
        sum_ref[...] = jnp.zeros_like(sum_ref)
        sq_ref[...] = jnp.zeros_like(sq_ref)

    x = x_ref[...].astype(jnp.float32)   # statistics always f32 (v5e has no bf16 VPU)
    tb, tk = x.shape
    xg = x.reshape(tb // 8, 8, tk)       # sublane-group view; leading-axis reduce = VPU adds
    sum_ref[...] += jnp.sum(xg, axis=0)
    sq_ref[...] += jnp.sum(xg * xg, axis=0)


# -----------------------------------------------------------------------------
# Pass 2a: resident-weight matmul.  Grid = (B tiles [parallel],).  The folded
# weight / bias blocks are constant across the grid -> DMAed once and kept in
# VMEM; x is cast in-kernel (no separate astype pass over HBM); no scratch.
# -----------------------------------------------------------------------------
def matmul_resident_kernel(x_ref, w_ref, b_ref, o_ref, *, compute_dtype):
    x = x_ref[...].astype(compute_dtype)
    acc = jnp.dot(x, w_ref[...], preferred_element_type=jnp.float32)
    o_ref[...] = (acc + b_ref[...].astype(jnp.float32)).astype(o_ref.dtype)


# -----------------------------------------------------------------------------
# Pass 2b (fallback for very large D*C): K/C-tiled matmul with an f32 VMEM
# accumulator seeded with the broadcast bias (no zero-fill + epilogue add).
# -----------------------------------------------------------------------------
def matmul_bias_kernel(x_ref, w_ref, b_ref, o_ref, acc_ref, *, compute_dtype):
    k = pl.program_id(2)

    @pl.when(k == 0)
    def _():
        acc_ref[...] = jnp.broadcast_to(b_ref[...].astype(jnp.float32), acc_ref.shape)

    acc_ref[...] += jnp.dot(x_ref[...].astype(compute_dtype), w_ref[...],
                            preferred_element_type=jnp.float32)

    @pl.when(k == pl.num_programs(2) - 1)
    def _():
        o_ref[...] = acc_ref[...].astype(o_ref.dtype)


def task_head(x, w_t, b, *, compute_dtype=jnp.float32,
              block_b=512, block_k=512, block_n=256,
              vmem_limit_bytes=_VMEM_LIMIT_BYTES):
    """TaskHead forward with training-mode BN folded into the Linear.

    x:   (B, D)     w_t: (D, C) torch Linear weight transposed     b: (1, C)
    compute_dtype: dtype fed to the MXU (bf16 doubles throughput / halves matmul
      HBM bytes; statistics and the fold stay f32 regardless).
    """
    B, D = x.shape
    C = w_t.shape[1]
    out_dtype = x.dtype
    wbytes = jnp.dtype(compute_dtype).itemsize

    Ba, Da, Ca = _round_up(B, 8), _round_up(D, 128), _round_up(C, 128)

    # ------------------ fused single-kernel fast path -------------------------
    fused_bytes = 4 * Ba * Da * 4 + 2 * Da * Ca * 4 + 3 * Ba * Ca * 4
    if fused_bytes <= _FUSED_VMEM_BUDGET:
        x_pad = jnp.pad(x, ((0, Ba - B), (0, Da - D)))
        w_pad = jnp.pad(w_t.astype(jnp.float32), ((0, Da - D), (0, Ca - C)))
        b_pad = jnp.pad(b.astype(jnp.float32).reshape(1, -1), ((0, 0), (0, Ca - C)))
        out = pl.pallas_call(
            functools.partial(fused_taskhead_kernel, n_batch=float(B),
                              compute_dtype=compute_dtype),
            out_shape=jax.ShapeDtypeStruct((Ba, Ca), out_dtype),
            grid_spec=pltpu.PrefetchScalarGridSpec(
                num_scalar_prefetch=0, grid=(1,),
                in_specs=[pl.BlockSpec((Ba, Da), lambda i: (0, 0)),
                          pl.BlockSpec((Da, Ca), lambda i: (0, 0)),
                          pl.BlockSpec((1, Ca), lambda i: (0, 0))],
                out_specs=pl.BlockSpec((Ba, Ca), lambda i: (0, 0))),
            compiler_params=pltpu.CompilerParams(
                dimension_semantics=("arbitrary",),
                vmem_limit_bytes=vmem_limit_bytes),
        )(x_pad, w_pad, b_pad)
        return out[:B, :C]

    # ------------------ tiling: tile count first, minimal padding -------------
    # Keep >= 2 D tiles when possible so the stats pass feeds both v7x TensorCores.
    bk, Dp = _pick_tile(D, block_k, 128, min_tiles=2 if Da >= 256 else 1)
    bn, Cp = _pick_tile(C, block_n, 128)

    # Resident-weight pass-2 working set (double-buffered where Pallas would).
    def _resident_need(bb_):
        return (2 * bb_ * Dp * 4          # x blocks (f32)
                + bb_ * Dp * wbytes        # in-kernel cast temporary
                + 2 * Dp * Cp * wbytes     # folded weight
                + 2 * bb_ * Cp * 4         # output blocks
                + 2 * Cp * 4)              # bias

    bb_cap = _round_up(min(block_b, Ba), 8)
    resident = _resident_need(bb_cap) <= _PASS2_VMEM_BUDGET
    while not resident and bb_cap > 64:
        bb_cap = max(64, _round_up(bb_cap // 2, 8))
        resident = _resident_need(bb_cap) <= _PASS2_VMEM_BUDGET
    bb, Bp = _pick_tile(B, bb_cap if resident else block_b, 8)

    # Single padded copy of x (native dtype) feeds BOTH passes; pass 2 casts in-kernel.
    x_pad = jnp.pad(x, ((0, Bp - B), (0, Dp - D)))
    w_pad = jnp.pad(w_t.astype(jnp.float32), ((0, Dp - D), (0, Cp - C)))
    b_pad = jnp.pad(b.astype(jnp.float32).reshape(1, -1), ((0, 0), (0, Cp - C)))

    # ------------------ pass 1: streaming batch statistics --------------------
    sum8, sq8 = pl.pallas_call(
        bn_stats_kernel,
        out_shape=(jax.ShapeDtypeStruct((8, Dp), jnp.float32),
                   jax.ShapeDtypeStruct((8, Dp), jnp.float32)),
        grid_spec=pltpu.PrefetchScalarGridSpec(
            num_scalar_prefetch=0,
            grid=(Dp // bk, Bp // bb),
            in_specs=[pl.BlockSpec((bb, bk), lambda d, i: (i, d))],
            out_specs=[pl.BlockSpec((8, bk), lambda d, i: (0, d)),
                       pl.BlockSpec((8, bk), lambda d, i: (0, d))]),
        compiler_params=pltpu.CompilerParams(
            dimension_semantics=("parallel", "arbitrary"),
            vmem_limit_bytes=vmem_limit_bytes),
        cost_estimate=pl.CostEstimate(
            flops=3 * Bp * Dp, transcendentals=0,
            bytes_accessed=Bp * Dp * x.dtype.itemsize + 2 * 8 * Dp * 4),
    )(x_pad)

    # ------------------ fold BN into the Linear (tiny O(D*C), f32) ------------
    # NOTE: streaming var = E[x^2] - mean^2 in f32; use a two-pass/Welford fold if
    # feature magnitudes can be extreme.
    mean = jnp.sum(sum8, axis=0, keepdims=True) / B                   # (1, Dp)
    var = jnp.maximum(jnp.sum(sq8, axis=0, keepdims=True) / B - mean * mean, 0.0)
    inv = jax.lax.rsqrt(var + EPS)
    w_fold = (w_pad * inv.T).astype(compute_dtype)                    # (Dp, Cp)
    b_fold = b_pad - (mean * inv) @ w_pad                             # (1, Cp) f32

    # ------------------ pass 2: x @ W' + b' ------------------------------------
    if resident:
        # Whole folded weight stays VMEM-resident (DMAed once); grid only over B
        # tiles (>= 2 for typical batches -> both v7x cores busy); no scratch.
        out = pl.pallas_call(
            functools.partial(matmul_resident_kernel, compute_dtype=compute_dtype),
            out_shape=jax.ShapeDtypeStruct((Bp, Cp), out_dtype),
            grid_spec=pltpu.PrefetchScalarGridSpec(
                num_scalar_prefetch=0,
                grid=(Bp // bb,),
                in_specs=[pl.BlockSpec((bb, Dp), lambda i: (i, 0)),
                          pl.BlockSpec((Dp, Cp), lambda i: (0, 0)),
                          pl.BlockSpec((1, Cp), lambda i: (0, 0))],
                out_specs=pl.BlockSpec((bb, Cp), lambda i: (i, 0))),
            compiler_params=pltpu.CompilerParams(
                dimension_semantics=("parallel",),
                vmem_limit_bytes=vmem_limit_bytes),
            cost_estimate=pl.CostEstimate(
                flops=2 * Bp * Dp * Cp, transcendentals=0,
                bytes_accessed=(Bp * Dp * x.dtype.itemsize + Dp * Cp * wbytes
                                + Bp * Cp * jnp.dtype(out_dtype).itemsize + Cp * 4)),
        )(x_pad, w_fold, b_fold)
    else:
        # Fallback for very large D*C: K/C-tiled, accumulator seeded with bias.
        out = pl.pallas_call(
            functools.partial(matmul_bias_kernel, compute_dtype=compute_dtype),
            out_shape=jax.ShapeDtypeStruct((Bp, Cp), out_dtype),
            grid_spec=pltpu.PrefetchScalarGridSpec(
                num_scalar_prefetch=0,
                grid=(Bp // bb, Cp // bn, Dp // bk),
                in_specs=[pl.BlockSpec((bb, bk), lambda i, j, k: (i, k)),
                          pl.BlockSpec((bk, bn), lambda i, j, k: (k, j)),
                          pl.BlockSpec((1, bn), lambda i, j, k: (0, j))],
                out_specs=pl.BlockSpec((bb, bn), lambda i, j, k: (i, j)),
                scratch_shapes=[pltpu.VMEM((bb, bn), jnp.float32)]),
            compiler_params=pltpu.CompilerParams(
                dimension_semantics=("parallel", "parallel", "arbitrary"),
                vmem_limit_bytes=vmem_limit_bytes),
            cost_estimate=pl.CostEstimate(
                flops=2 * Bp * Dp * Cp, transcendentals=0,
                bytes_accessed=(Bp * Dp * x.dtype.itemsize
                                + (Bp // bb) * Dp * Cp * wbytes
                                + Bp * Cp * jnp.dtype(out_dtype).itemsize + Cp * 4)),
        )(x_pad, w_fold, b_fold)

    return out[:B, :C]


def task_head_reference(x, w_t, b):
    # Pure-JAX reference for training-mode BN (no affine) + Linear.
    mean = jnp.mean(x, axis=0, keepdims=True)
    var = jnp.mean((x - mean) ** 2, axis=0, keepdims=True)
    xn = (x - mean) / jnp.sqrt(var + EPS)
    return xn @ w_t + b


if __name__ == "__main__":
    key = jax.random.PRNGKey(0)
    kx, kw, kx2, kw2 = jax.random.split(key, 4)

    # --- small shape (fused single-kernel path), consistent with the module ----
    B, DIM, N_CLASS = 8, 32, 16
    x = jax.random.normal(kx, (B, DIM), dtype=jnp.float32)
    # nn.Linear(dim, n_class): weight ~ N(0, 0.01), bias = 0 (per MLP.__init__)
    w = 0.01 * jax.random.normal(kw, (N_CLASS, DIM), dtype=jnp.float32)  # (out, in)
    b = jnp.zeros((1, N_CLASS), dtype=jnp.float32)
    w_t = w.T                                                            # (DIM, N_CLASS)

    ref = task_head_reference(x, w_t, b)
    out = jax.block_until_ready(
        jax.jit(functools.partial(task_head, compute_dtype=jnp.float32))(x, w_t, b))
    assert out.shape == (B, N_CLASS)
    assert jnp.allclose(out, ref, atol=5e-4, rtol=5e-4), "small f32 mismatch vs reference"

    out_bf16 = jax.block_until_ready(
        jax.jit(functools.partial(task_head, compute_dtype=jnp.bfloat16))(x, w_t, b))
    assert out_bf16.shape == (B, N_CLASS)
    assert jnp.allclose(out_bf16, ref, atol=5e-3, rtol=5e-2), "small bf16 mismatch"

    # --- misaligned medium shape (stats pass + resident-weight matmul path) ----
    B2, DIM2, N_CLASS2 = 523, 600, 200
    x2 = jax.random.normal(kx2, (B2, DIM2), dtype=jnp.float32)
    w2 = 0.01 * jax.random.normal(kw2, (N_CLASS2, DIM2), dtype=jnp.float32)
    b2 = jnp.zeros((1, N_CLASS2), dtype=jnp.float32)
    ref2 = task_head_reference(x2, w2.T, b2)

    out2 = jax.block_until_ready(
        jax.jit(functools.partial(task_head, compute_dtype=jnp.float32))(x2, w2.T, b2))
    assert out2.shape == (B2, N_CLASS2)
    assert jnp.allclose(out2, ref2, atol=5e-3, rtol=5e-2), "medium f32 mismatch"

    out2_bf16 = jax.block_until_ready(
        jax.jit(functools.partial(task_head, compute_dtype=jnp.bfloat16))(x2, w2.T, b2))
    assert out2_bf16.shape == (B2, N_CLASS2)
    assert jnp.allclose(out2_bf16, ref2, atol=1e-2, rtol=5e-2), "medium bf16 mismatch"

    print("KERNEL_OK")
</pallas_src>

<mosaic_0001>
module attributes {stable_mosaic.version = 11 : i64} {
  func.func @fused_taskhead_kernel(%arg0: i32, %arg1: memref<8x128xf32, #tpu.memory_space<vmem>>, %arg2: memref<128x128xf32, #tpu.memory_space<vmem>>, %arg3: memref<1x128xf32, #tpu.memory_space<vmem>>, %arg4: memref<8x128xf32, #tpu.memory_space<vmem>>) attributes {dimension_semantics = [#tpu.dimension_semantics<arbitrary>], iteration_bounds = array<i64: 1>, scalar_prefetch = 0 : i64, scratch_operands = 0 : i64, tpu.core_type = #tpu.core_type<tc>, window_params = [{pipeline_mode = #tpu.pipeline_mode<synchronous>, transform_indices = @transform_0, window_bounds = array<i64: 8, 128>}, {pipeline_mode = #tpu.pipeline_mode<synchronous>, transform_indices = @transform_1, window_bounds = array<i64: 128, 128>}, {pipeline_mode = #tpu.pipeline_mode<synchronous>, transform_indices = @transform_2, window_bounds = array<i64: 1, 128>}, {pipeline_mode = #tpu.pipeline_mode<synchronous>, transform_indices = @transform_3, window_bounds = array<i64: 8, 128>}]} {
    %c0 = arith.constant 0 : index
    %c0_0 = arith.constant 0 : index
    %0 = vector.load %arg1[%c0, %c0_0] : memref<8x128xf32, #tpu.memory_space<vmem>>, vector<8x128xf32>
    %cst = arith.constant dense<0.000000e+00> : vector<128xf32>
    %1 = vector.multi_reduction <add>, %0, %cst [0] : vector<8x128xf32> to vector<128xf32>
    %2 = vector.shape_cast %1 : vector<128xf32> to vector<1x128xf32>
    %cst_1 = arith.constant 1.250000e-01 : f32
    %3 = vector.broadcast %cst_1 : f32 to vector<1x128xf32>
    %4 = arith.mulf %2, %3 : vector<1x128xf32>
    %5 = arith.mulf %0, %0 : vector<8x128xf32>
    %cst_2 = arith.constant dense<0.000000e+00> : vector<128xf32>
    %6 = vector.multi_reduction <add>, %5, %cst_2 [0] : vector<8x128xf32> to vector<128xf32>
    %7 = vector.shape_cast %6 : vector<128xf32> to vector<1x128xf32>
    %cst_3 = arith.constant 1.250000e-01 : f32
    %8 = vector.broadcast %cst_3 : f32 to vector<1x128xf32>
    %9 = arith.mulf %7, %8 : vector<1x128xf32>
    %10 = arith.mulf %4, %4 : vector<1x128xf32>
    %11 = arith.subf %9, %10 : vector<1x128xf32>
    %cst_4 = arith.constant 0.000000e+00 : f32
    %12 = vector.broadcast %cst_4 : f32 to vector<1x128xf32>
    %13 = arith.maximumf %11, %12 : vector<1x128xf32>
    %cst_5 = arith.constant 9.99999974E-6 : f32
    %14 = vector.broadcast %cst_5 : f32 to vector<1x128xf32>
    %15 = arith.addf %13, %14 : vector<1x128xf32>
    %16 = math.rsqrt %15 : vector<1x128xf32>
    %17 = vector.broadcast %4 : vector<1x128xf32> to vector<8x128xf32>
    %18 = arith.subf %0, %17 : vector<8x128xf32>
    %19 = vector.broadcast %16 : vector<1x128xf32> to vector<8x128xf32>
    %20 = arith.mulf %18, %19 : vector<8x128xf32>
    %c0_6 = arith.constant 0 : index
    %c0_7 = arith.constant 0 : index
    %21 = vector.load %arg2[%c0_6, %c0_7] : memref<128x128xf32, #tpu.memory_space<vmem>>, vector<128x128xf32>
    %cst_8 = arith.constant dense<0.000000e+00> : vector<8x128xf32>
    %22 = tpu.matmul %20, %21, %cst_8 {dimension_numbers = #tpu.dot_dimension_numbers<[1], [0], [0], [1], [0, 0, 1, 1], [], []>} : vector<8x128xf32>, vector<128x128xf32>, vector<8x128xf32> -> vector<8x128xf32>
    %c0_9 = arith.constant 0 : index
    %c0_10 = arith.constant 0 : index
    %23 = vector.load %arg3[%c0_9, %c0_10] : memref<1x128xf32, #tpu.memory_space<vmem>>, vector<1x128xf32>
    %24 = vector.broadcast %23 : vector<1x128xf32> to vector<8x128xf32>
    %25 = arith.addf %22, %24 : vector<8x128xf32>
    %c0_11 = arith.constant 0 : index
    %c0_12 = arith.constant 0 : index
    %26 = vector.load %arg4[%c0_11, %c0_12] : memref<8x128xf32, #tpu.memory_space<vmem>>, vector<8x128xf32>
    tpu.vector_store %arg4[%c0_11, %c0_12], %25 {strides = array<i32>} : memref<8x128xf32, #tpu.memory_space<vmem>>, vector<8x128xf32>,
    return
  }
  func.func @transform_0(%arg0: i32) -> (i32, i32) {
    %c0_i32 = arith.constant 0 : i32
    %c0_i32_0 = arith.constant 0 : i32
    %c0_i32_1 = arith.constant 0 : i32
    return %c0_i32, %c0_i32_0 : i32, i32
  }
  func.func @transform_1(%arg0: i32) -> (i32, i32) {
    %c0_i32 = arith.constant 0 : i32
    %c0_i32_0 = arith.constant 0 : i32
    %c0_i32_1 = arith.constant 0 : i32
    return %c0_i32, %c0_i32_0 : i32, i32
  }
  func.func @transform_2(%arg0: i32) -> (i32, i32) {
    %c0_i32 = arith.constant 0 : i32
    %c0_i32_0 = arith.constant 0 : i32
    %c0_i32_1 = arith.constant 0 : i32
    return %c0_i32, %c0_i32_0 : i32, i32
  }
  func.func @transform_3(%arg0: i32) -> (i32, i32) {
    %c0_i32 = arith.constant 0 : i32
    %c0_i32_0 = arith.constant 0 : i32
    %c0_i32_1 = arith.constant 0 : i32
    return %c0_i32, %c0_i32_0 : i32, i32
  }
}

</mosaic_0001>

<bundles_post_ra>
// kernel: task_head.1
= control target key start
LH: loop header
LB: loop body
LE: loop exit
PB: predicated region body
PF: predicated region fallthrough
CT: control target
= control target key end

     0   :  { %v253_v3 = vmov 0.0|0.0   ;;  %vm254_vm0 = vmmov 0   ;;  %v255_v6 = vmov 0.0   ;;  %s343_s0 = inlined_call_operand.vmem [shape: f32[8,128], index: 0, kind: input, shape index: {}]   ;;  %s344_s1 = inlined_call_operand.vmem [shape: f32[128,128], index: 1, kind: input, shape index: {}]   ;;  %s345_s2 = inlined_call_operand.vmem [shape: f32[1,128], index: 2, kind: input, shape index: {}]   ;;  %s346_s3 = inlined_call_operand.hbm [shape: f32[8,128], index: 3, kind: output, shape index: {}]  }
   0x1   :  { %v38_v0 = vld [vmem:[%s344_s1] sm:$0xff]  ;;  %v39_v1 = vld [vmem:[%s344_s1 + $0x8] sm:$0xff]  ;;  %v40_v2 = vld [vmem:[%s344_s1 + $0x10] sm:$0xff]  ;;  %199 = vmatprep.subr.bf16.mxu0 %v253_v3  ;;  %196 = vmatprep.mubr.msk.f32.mxu0 %vm254_vm0, %v255_v6 }
   0x2   :  { %v200_v4 = vpack.c.bf16 %v39_v1, %v38_v0  ;;  %v41_v5 = vld [vmem:[%s344_s1 + $0x18] sm:$0xff]  ;;  %v42_v8 = vld [vmem:[%s344_s1 + $0x20] sm:$0xff]  ;;  %v43_v9 = vld [vmem:[%s344_s1 + $0x28] sm:$0xff] }
   0x3   :  { %v203_v7 = vpack.c.bf16 %v41_v5, %v40_v2  ;;  %v15_v10 = vld [vmem:[%s343_s0] sm:$0xff] }
   0x4   :  { %201 = vmatpush3.bf16.msra.mxu0 %v200_v4  ;;  %v16_v11 = vrot.slane %v15_v10, 4  ;;  %v23_v12 = vmul.f32 %v15_v10, %v15_v10 }
   0x5   :  { %202 = vmatprep.subr.bf16.mxu0 %v253_v3 }
   0x6   :  { %8 = vsyncpa [#allocation3], 0  ;;  %v206_v13 = vpack.c.bf16 %v43_v9, %v42_v8  ;;  %v44_v14 = vld [vmem:[%s344_s1 + $0x30] sm:$0xff]  ;;  %v45_v15 = vld [vmem:[%s344_s1 + $0x38] sm:$0xff]  ;;  %v17_v16 = vadd.f32 %v16_v11, %v15_v10  ;;  %v24_v17 = vrot.slane %v23_v12, 4  ;;  %s256_s20 = smov [#allocation2]  }
   0x7   :  { %v209_v20 = vpack.c.bf16 %v45_v15, %v44_v14  ;;  %v46_v21 = vld [vmem:[%s344_s1 + $0x40] sm:$0xff]  ;;  %v47_v22 = vld [vmem:[%s344_s1 + $0x48] sm:$0xff]  ;;  %v48_v28 = vld [vmem:[%s344_s1 + $0x50] sm:$0xff]  ;;  %s138_s21 = sshll.u32 %s256_s20, 4  ;;  %s139_s21 = int_to_ptr.vmem [resolvable:$true] %s138_s21 }
   0x8   :  { %204 = vmatpush3.bf16.msra.mxu0 %v203_v7  ;;  %v18_v18 = vrot.slane %v17_v16, 2  ;;  %v25_v19 = vadd.f32 %v24_v17, %v23_v12  ;;  %v212_v27 = vpack.c.bf16 %v47_v22, %v46_v21  ;;  %v49_v29 = vld [vmem:[%s344_s1 + $0x58] sm:$0xff]  ;;  %v50_v35 = vld [vmem:[%s344_s1 + $0x60] sm:$0xff]  ;;  %v51_v36 = vld [vmem:[%s344_s1 + $0x68] sm:$0xff]  ;;  %p234_p1 = scmp.lt.s32.totalorder %s139_s21, %s139_s21 }
   0x9   :  { %205 = vmatprep.subr.bf16.mxu0 %v253_v3  ;;  %v215_v34 = vpack.c.bf16 %v49_v29, %v48_v28  ;;  %v218_v40 = vpack.c.bf16 %v51_v36, %v50_v35  ;;  %v52_v41 = vld [vmem:[%s344_s1 + $0x70] sm:$0xff]  ;;  %v53_v42 = vld [vmem:[%s344_s1 + $0x78] sm:$0xff]  ;;  %v146_v49 = vld [vmem:[%s345_s2] ss:$0 sm:$0xff]  ;;  %s229_s1 = scalar_lea.vmem %s139_s21, 128 }
   0xa   :  { %v19_v23 = vadd.f32 %v18_v18, %v17_v16  ;;  %v26_v24 = vrot.slane %v25_v19, 2  ;;  %v221_v45 = vpack.c.bf16 %v53_v42, %v52_v41  ;;  %p230_p0 = scmp.ne.s32.totalorder %s139_s21, %s229_s1  ;;  %p235_p2 = scmp.lt.s32.totalorder %s229_s1, %s229_s1 }
   0xc   :  { %207 = vmatpush3.bf16.msra.mxu0 %v206_v13  ;;  %v20_v25 = vrot.slane %v19_v23, 1  ;;  %v27_v26 = vadd.f32 %v26_v24, %v25_v19  ;;  %p236_p3 = por %p235_p2, %p234_p1 }
   0xd   :  { %208 = vmatprep.subr.bf16.mxu0 %v253_v3 }
   0xe   :  { %v21_v30 = vadd.f32 %v20_v25, %v19_v23  ;;  %v28_v31 = vrot.slane %v27_v26, 1  ;;  %p237_p4 = pnand %p236_p3, %p230_p0 }
  0x10   :  { %210 = vmatpush3.bf16.msra.mxu0 %v209_v20  ;;  %v22_v32 = vmul.f32 0.125, %v21_v30  ;;  %v29_v33 = vadd.f32 %v28_v31, %v27_v26 }
  0x11   :  { %211 = vmatprep.subr.bf16.mxu0 %v253_v3 }
  0x12   :  { %v30_v37 = vmul.f32 0.125, %v29_v33  ;;  %v31_v38 = vmul.f32 %v22_v32, %v22_v32  ;;  %v36_v46 = vsub.f32 %v15_v10, %v22_v32 }
  0x14   :  { %213 = vmatpush3.bf16.msra.mxu0 %v212_v27  ;;  %v32_v39 = vsub.f32 %v30_v37, %v31_v38 }
  0x15   :  { %214 = vmatprep.subr.bf16.mxu0 %v253_v3 }
  0x16   :  { %v33_v43 = vmax.f32 %v32_v39, 0.0 }
  0x18   :  { %216 = vmatpush3.bf16.msra.mxu0 %v215_v34  ;;  %v34_v44 = vadd.f32 1e-05, %v33_v43 }
  0x19   :  { %217 = vmatprep.subr.bf16.mxu0 %v253_v3 }
  0x1a   :  { %227 = vrsqrt.f32 %v34_v44 }
  0x1c   :  { %219 = vmatpush3.bf16.msra.mxu0 %v218_v40 }
  0x1d   :  { %220 = vmatprep.subr.bf16.mxu0 %v253_v3 }
  0x20   :  { %222 = vmatpush3.bf16.msra.mxu0 %v221_v45 }
  0x24   :  { %v228_v47 = vpop.eup %227 }
  0x25   :  { %v37_v48 = vmul.f32 %v228_v47, %v36_v46 }
  0x27   :  { %197 = vmatmul.mubr.f32.vlgmr.msra.gmra.mrb[0].mxu0 %v37_v48 }
  0xfa   :  { %v127_v50 = vpop.f32.mrb[0].mxu0 }
  0xfb   :  { %v128_v51 = vadd.f32 %v146_v49, %v127_v50  ;;  %v198_v52 = vpop.f32.mrb[1].mxu0 }
  0xfd   :  { %131 = vst [vmem:[#allocation2] sm:$0xff] %v128_v51 }
  0xfe   :  { %240 = shalt.err (!%p237_p4)
}
  0xff   :  { %s241_s24 = scalar_lea.hbm %s346_s3, 128 }
 0x100   :  { %p242_p5 = scmp.ne.s32.totalorder %s346_s3, %s241_s24  ;;  %p245_p6 = scmp.lt.u32.totalorder %s241_s24, %s346_s3 }
 0x102   :  { %p247_p7 = pnand %p245_p6, %p242_p5 }
 0x104   :  { %250 = shalt.err (!%p247_p7)
}
 0x105   :  { %141 = dma.vmem_to_hbm [thread:$0]  %s139_s21, 128, %s346_s3, [#allocation3]  }
 0x106   :  { %251 = dma.done.wait [#allocation3], 128  }
 0x107   :  { %252 = vsyncadd [#allocation3], 4294967168 }
 0x108   :  { %145 = vsyncpa [#allocation3], 1 }

</bundles_post_ra>
